<compile_context>
chip_gen: v5e
topology: v5e:2x2
jax: 0.10.0
libtpu: 0.0.40
codegen_flags: <defaults>
</compile_context>

<pallas_src>
import functools

import jax
import jax.numpy as jnp
from jax.experimental import pallas as pl
from jax.experimental.pallas import tpu as pltpu


# ----------------------------------------------------------------------------
# Kernel bodies
# ----------------------------------------------------------------------------

def _cm_fused_kernel(xr_ref, xk_ref, wr_ref, wk_ref, wv_ref, o_ref):
    """Small-C fast path.  grid = (M // TM,).

    All weights stay VMEM-resident (constant index maps -> fetched from HBM
    exactly once); the whole chain runs per token tile, no scratch needed.
    """
    k = jnp.dot(xk_ref[...], wk_ref[...], preferred_element_type=jnp.float32)
    k = jnp.maximum(k, 0.0)
    ksq = (k * k).astype(wv_ref.dtype)               # feed MXU in weight dtype
    v = jnp.dot(ksq, wv_ref[...], preferred_element_type=jnp.float32)
    r = jnp.dot(xr_ref[...], wr_ref[...], preferred_element_type=jnp.float32)
    o_ref[...] = (jax.nn.sigmoid(r) * v).astype(o_ref.dtype)


def _cm_tiled_kernel(xr_ref, xk_ref, wr_ref, wk_ref, wv_ref, o_ref, *scratch,
                     stream_wr: bool):
    """Hidden-dim-tiled path.  grid = (M // TM, H // TH); h is a reduction.

    v is accumulated into an f32 VMEM scratch.  If `stream_wr`, W_r is
    streamed in (C/num_h, C) row-slabs across the h axis (partial r into a
    second f32 scratch); otherwise W_r stays resident and r is computed once
    in the finalize step (small-C fallback).
    """
    h = pl.program_id(1)
    if stream_wr:
        acc_v, acc_r = scratch
    else:
        (acc_v,) = scratch

    @pl.when(h == 0)
    def _init():
        acc_v[...] = jnp.zeros_like(acc_v)
        if stream_wr:
            acc_r[...] = jnp.zeros_like(acc_r)

    # k projection for this hidden tile, squared ReLU, accumulate v.
    k = jnp.dot(xk_ref[...], wk_ref[...], preferred_element_type=jnp.float32)
    k = jnp.maximum(k, 0.0)
    ksq = (k * k).astype(wv_ref.dtype)
    acc_v[...] += jnp.dot(ksq, wv_ref[...], preferred_element_type=jnp.float32)

    if stream_wr:
        # Partial r: lane-aligned column chunk of xr x row-slab of W_r.
        acc_r[...] += jnp.dot(xr_ref[...], wr_ref[...],
                              preferred_element_type=jnp.float32)

    @pl.when(h == pl.num_programs(1) - 1)
    def _finalize():
        if stream_wr:
            r = acc_r[...]
        else:
            r = jnp.dot(xr_ref[...], wr_ref[...],
                        preferred_element_type=jnp.float32)
        o_ref[...] = (jax.nn.sigmoid(r) * acc_v[...]).astype(o_ref.dtype)


# ----------------------------------------------------------------------------
# Tile / budget helpers
# ----------------------------------------------------------------------------

def _tpu_kind() -> str:
    try:
        return jax.devices()[0].device_kind.lower()
    except Exception:
        return ""


def _vmem_budget_bytes(kind: str) -> int:
    if "v7" in kind or "tpu7" in kind:
        return 56 * 1024 * 1024       # v7x: 64 MiB per TensorCore
    if "v5" in kind or "v6" in kind:
        return 100 * 1024 * 1024      # v5e / v6e: 128 MiB physical VMEM
    return 64 * 1024 * 1024           # conservative default


def _pick_tile(extent, preferred, align):
    """Largest t <= preferred with extent % t == 0 and t % align == 0,
    falling back to the full extent (always legal)."""
    t = min(preferred, extent)
    t -= t % align
    while t >= align:
        if extent % t == 0:
            return t
        t -= align
    return extent


# ----------------------------------------------------------------------------
# Wrapper
# ----------------------------------------------------------------------------

@functools.partial(jax.jit, static_argnames=("tm", "th"))
def channel_mixing(x, r_weight, k_weight, w_r, w_k, w_v, tm=None, th=None):
    B, T, C = x.shape
    H = w_k.shape[1]                              # 4 * C
    M = B * T
    dtype = x.dtype
    itemsize = x.dtype.itemsize

    # Token shift: xx[t] = x[t-1], xx[0] = 0.
    xx = jnp.pad(x, ((0, 0), (1, 0), (0, 0)))[:, :-1, :]
    xxx = xx - x
    # Hoisted mixes (same HBM bytes as shipping x + xxx; removes per-h VALU work).
    rw = r_weight.astype(dtype)[None, None, :]
    kw = k_weight.astype(dtype)[None, None, :]
    xr = (x + xxx * rw).reshape(M, C)
    xk = (x + xxx * kw).reshape(M, C)
    w_r = w_r.astype(dtype)
    w_k = w_k.astype(dtype)
    w_v = w_v.astype(dtype)

    kind = _tpu_kind()
    budget = _vmem_budget_bytes(kind)
    is_v7 = "v7" in kind or "tpu7" in kind

    tm_auto = tm is None
    th_auto = th is None

    # ---- token tile ----------------------------------------------------------
    if tm_auto:
        tm_pref = 256 if is_v7 else 512           # v7x: 64 MiB/TC -> smaller tiles
        if M >= 32:
            # Keep >= 2 m-steps so the "parallel" axis can occupy both v7x TCs.
            tm_pref = min(tm_pref, max(16, M // 2))
        tm = _pick_tile(M, tm_pref, 16)           # 16: bf16 packs 2 rows/sublane
    assert M % tm == 0 and (tm % 8 == 0 or tm == M)

    flops = 2 * M * (C * H + H * C + C * C)
    transcendentals = M * C                       # sigmoid

    # ---- small-C fast path: everything resident, no hidden-axis grid --------
    fused_bytes = (2 * (C * H + H * C + C * C) * itemsize     # weights (2-buf)
                   + 2 * 3 * tm * C * itemsize                # xr, xk, out (2-buf)
                   + 2 * tm * H * 4)                          # f32 k headroom
    if th_auto and fused_bytes <= int(0.7 * budget):
        bytes_accessed = (3 * M * C + C * H + H * C + C * C) * itemsize
        out = pl.pallas_call(
            _cm_fused_kernel,
            out_shape=jax.ShapeDtypeStruct((M, C), dtype),
            grid_spec=pltpu.PrefetchScalarGridSpec(
                num_scalar_prefetch=0,
                grid=(M // tm,),
                in_specs=[
                    pl.BlockSpec((tm, C), lambda m: (m, 0)),   # xr
                    pl.BlockSpec((tm, C), lambda m: (m, 0)),   # xk
                    pl.BlockSpec((C, C), lambda m: (0, 0)),    # W_r (resident)
                    pl.BlockSpec((C, H), lambda m: (0, 0)),    # W_k (resident)
                    pl.BlockSpec((H, C), lambda m: (0, 0)),    # W_v (resident)
                ],
                out_specs=pl.BlockSpec((tm, C), lambda m: (m, 0)),
            ),
            compiler_params=pltpu.CompilerParams(
                dimension_semantics=("parallel",),
                vmem_limit_bytes=budget,
            ),
            cost_estimate=pl.CostEstimate(
                flops=flops, transcendentals=transcendentals,
                bytes_accessed=int(bytes_accessed)),
        )(xr, xk, w_r, w_k, w_v)
        return out.reshape(B, T, C)

    # ---- hidden-axis-tiled path ----------------------------------------------
    if th_auto:
        th = _pick_tile(H, 512, 128)              # th >= 512 keeps DMA rows >=1 KiB
    assert H % th == 0 and (th % 128 == 0 or th == H)

    def _stream_cfg(s):
        nh = H // s
        ch = C // nh if C % nh == 0 else 0
        # Stream W_r only when the per-step xr column chunk is lane-aligned.
        return (nh > 1 and ch > 0 and ch % 128 == 0), (ch if ch > 0 else C)

    def _tiled_bytes(t, s):
        stream, ch = _stream_cfg(s)
        ch_r = ch if stream else C
        w = 2 * (C * s + s * C + ch_r * C) * itemsize      # W_k, W_v, W_r (2-buf)
        a = 2 * (2 * t * C + t * ch_r) * itemsize          # xk, out, xr (2-buf)
        scr = (2 if stream else 1) * t * C * 4 + t * s * 4 # f32 accs + k tile
        return w + a + scr

    # Shrink auto-picked tiles if the VMEM estimate overshoots the budget.
    while tm_auto and _tiled_bytes(tm, th) > int(0.85 * budget):
        new_tm = _pick_tile(M, max(16, tm // 2), 16)
        if new_tm >= tm:
            break
        tm = new_tm
    while th_auto and _tiled_bytes(tm, th) > int(0.85 * budget):
        new_th = _pick_tile(H, max(128, th // 2), 128)
        if new_th >= th:
            break
        th = new_th

    num_h = H // th
    stream_wr, chunk = _stream_cfg(th)

    if stream_wr:
        xr_spec = pl.BlockSpec((tm, chunk), lambda m, h: (m, h))
        wr_spec = pl.BlockSpec((chunk, C), lambda m, h: (h, 0))
        scratch = [pltpu.VMEM((tm, C), jnp.float32),   # v accumulator
                   pltpu.VMEM((tm, C), jnp.float32)]   # r accumulator
    else:
        xr_spec = pl.BlockSpec((tm, C), lambda m, h: (m, 0))
        wr_spec = pl.BlockSpec((C, C), lambda m, h: (0, 0))
        scratch = [pltpu.VMEM((tm, C), jnp.float32)]   # v accumulator

    bytes_accessed = (3 * M * C * itemsize
                      + (M // tm) * (C * H + H * C) * itemsize
                      + ((M // tm) if stream_wr else 1) * C * C * itemsize)

    kernel = functools.partial(_cm_tiled_kernel, stream_wr=stream_wr)

    out = pl.pallas_call(
        kernel,
        out_shape=jax.ShapeDtypeStruct((M, C), dtype),
        grid_spec=pltpu.PrefetchScalarGridSpec(
            num_scalar_prefetch=0,
            grid=(M // tm, num_h),
            in_specs=[
                xr_spec,                                      # xr (chunked if streaming)
                pl.BlockSpec((tm, C), lambda m, h: (m, 0)),   # xk
                wr_spec,                                      # W_r (streamed or resident)
                pl.BlockSpec((C, th), lambda m, h: (0, h)),   # W_k (in, out) H-tiled
                pl.BlockSpec((th, C), lambda m, h: (h, 0)),   # W_v (in, out) H-tiled
            ],
            out_specs=pl.BlockSpec((tm, C), lambda m, h: (m, 0)),
            scratch_shapes=scratch,
        ),
        compiler_params=pltpu.CompilerParams(
            dimension_semantics=("parallel", "arbitrary"),
            vmem_limit_bytes=budget,
        ),
        cost_estimate=pl.CostEstimate(
            flops=flops, transcendentals=transcendentals,
            bytes_accessed=int(bytes_accessed)),
    )(xr, xk, w_r, w_k, w_v)
    return out.reshape(B, T, C)


def channel_mixing_ref(x, r_weight, k_weight, w_r, w_k, w_v):
    """Pure-JAX reference matching the PyTorch forward."""
    xx = jnp.pad(x, ((0, 0), (1, 0), (0, 0)))[:, :-1, :]   # token shift
    xxx = xx - x
    r = (x + xxx * r_weight[None, None, :]) @ w_r
    k = (x + xxx * k_weight[None, None, :]) @ w_k
    v = (jnp.maximum(k, 0.0) ** 2) @ w_v
    return jax.nn.sigmoid(r) * v


if __name__ == "__main__":
    block_id, n_blocks = 1, 4
    r1 = 1.0 - block_id / n_blocks

    # ---- case 1: f32, small C -> fused fast path (weights fully resident) ----
    B, T, dim = 2, 8, 64
    k1, k2, k3, k4 = jax.random.split(jax.random.PRNGKey(0), 4)
    x = jax.random.normal(k1, (B, T, dim), dtype=jnp.float32)
    i = jnp.arange(dim, dtype=jnp.float32)
    r_weight = 1.0 - (i / dim) ** r1
    k_weight = 1.0 - (i / dim) ** r1
    # NOTE: the PyTorch module inits r_proj / v_proj to zeros (output would be
    # identically 0); use small random weights so the kernel is exercised.
    w_r = 0.1 * jax.random.normal(k2, (dim, dim), dtype=jnp.float32)
    w_k = 0.1 * jax.random.normal(k3, (dim, 4 * dim), dtype=jnp.float32)
    w_v = 0.1 * jax.random.normal(k4, (4 * dim, dim), dtype=jnp.float32)

    out = jax.block_until_ready(
        channel_mixing(x, r_weight, k_weight, w_r, w_k, w_v))
    ref = channel_mixing_ref(x, r_weight, k_weight, w_r, w_k, w_v)
    assert out.shape == (B, T, dim)
    assert jnp.allclose(out, ref, atol=1e-5, rtol=1e-5), "fast path f32 mismatch"

    # ---- case 2: f32, forced hidden-axis tiling (resident-W_r fallback) ------
    out_t = jax.block_until_ready(
        channel_mixing(x, r_weight, k_weight, w_r, w_k, w_v, tm=8, th=128))
    assert jnp.allclose(out_t, ref, atol=1e-5, rtol=1e-5), "tiled f32 mismatch"

    # ---- case 3: bf16, larger C -> streamed-W_r reduction path ----------------
    dim2 = 256
    bf16 = jnp.bfloat16
    k5, k6, k7, k8 = jax.random.split(jax.random.PRNGKey(1), 4)
    x2 = jax.random.normal(k5, (B, T, dim2), dtype=jnp.float32)
    i2 = jnp.arange(dim2, dtype=jnp.float32)
    rw2 = 1.0 - (i2 / dim2) ** r1
    kw2 = 1.0 - (i2 / dim2) ** r1
    wr2 = 0.1 * jax.random.normal(k6, (dim2, dim2), dtype=jnp.float32)
    wk2 = 0.1 * jax.random.normal(k7, (dim2, 4 * dim2), dtype=jnp.float32)
    wv2 = 0.05 * jax.random.normal(k8, (4 * dim2, dim2), dtype=jnp.float32)

    out_bf = jax.block_until_ready(
        channel_mixing(x2.astype(bf16), rw2, kw2,
                       wr2.astype(bf16), wk2.astype(bf16), wv2.astype(bf16),
                       tm=16, th=512))
    ref_bf = channel_mixing_ref(
        x2.astype(bf16).astype(jnp.float32),
        rw2.astype(bf16).astype(jnp.float32),
        kw2.astype(bf16).astype(jnp.float32),
        wr2.astype(bf16).astype(jnp.float32),
        wk2.astype(bf16).astype(jnp.float32),
        wv2.astype(bf16).astype(jnp.float32))
    assert out_bf.shape == (B, T, dim2)
    # Kernel squares/casts relu(k)^2 in bf16 before the second matmul; the f32
    # reference does not -> loose tolerance on the bf16 path.
    assert jnp.allclose(out_bf.astype(jnp.float32), ref_bf, atol=2e-1, rtol=2e-1), \
        "bf16 streamed-W_r mismatch"

    print("KERNEL_OK")
</pallas_src>

<mosaic_0001>
module attributes {stable_mosaic.version = 11 : i64} {
  func.func @_cm_fused_kernel(%arg0: i32, %arg1: memref<16x64xf32, #tpu.memory_space<vmem>>, %arg2: memref<16x64xf32, #tpu.memory_space<vmem>>, %arg3: memref<64x64xf32, #tpu.memory_space<vmem>>, %arg4: memref<64x256xf32, #tpu.memory_space<vmem>>, %arg5: memref<256x64xf32, #tpu.memory_space<vmem>>, %arg6: memref<16x64xf32, #tpu.memory_space<vmem>>) attributes {dimension_semantics = [#tpu.dimension_semantics<parallel>], iteration_bounds = array<i64: 1>, scalar_prefetch = 0 : i64, scratch_operands = 0 : i64, tpu.core_type = #tpu.core_type<tc>, window_params = [{transform_indices = @transform_0, window_bounds = array<i64: 16, 64>}, {transform_indices = @transform_1, window_bounds = array<i64: 16, 64>}, {pipeline_mode = #tpu.pipeline_mode<synchronous>, transform_indices = @transform_2, window_bounds = array<i64: 64, 64>}, {pipeline_mode = #tpu.pipeline_mode<synchronous>, transform_indices = @transform_3, window_bounds = array<i64: 64, 256>}, {pipeline_mode = #tpu.pipeline_mode<synchronous>, transform_indices = @transform_4, window_bounds = array<i64: 256, 64>}, {transform_indices = @transform_5, window_bounds = array<i64: 16, 64>}]} {
    %c0 = arith.constant 0 : index
    %c0_0 = arith.constant 0 : index
    %0 = vector.load %arg2[%c0, %c0_0] : memref<16x64xf32, #tpu.memory_space<vmem>>, vector<16x64xf32>
    %c0_1 = arith.constant 0 : index
    %c0_2 = arith.constant 0 : index
    %1 = vector.load %arg4[%c0_1, %c0_2] : memref<64x256xf32, #tpu.memory_space<vmem>>, vector<64x256xf32>
    %cst = arith.constant dense<0.000000e+00> : vector<16x256xf32>
    %2 = tpu.matmul %0, %1, %cst {dimension_numbers = #tpu.dot_dimension_numbers<[1], [0], [0], [1], [0, 0, 1, 1], [], []>} : vector<16x64xf32>, vector<64x256xf32>, vector<16x256xf32> -> vector<16x256xf32>
    %cst_3 = arith.constant 0.000000e+00 : f32
    %3 = vector.broadcast %cst_3 : f32 to vector<16x256xf32>
    %4 = arith.maximumf %2, %3 : vector<16x256xf32>
    %5 = arith.mulf %4, %4 : vector<16x256xf32>
    %c0_4 = arith.constant 0 : index
    %c0_5 = arith.constant 0 : index
    %6 = vector.load %arg5[%c0_4, %c0_5] : memref<256x64xf32, #tpu.memory_space<vmem>>, vector<256x64xf32>
    %cst_6 = arith.constant dense<0.000000e+00> : vector<16x64xf32>
    %7 = tpu.matmul %5, %6, %cst_6 {dimension_numbers = #tpu.dot_dimension_numbers<[1], [0], [0], [1], [0, 0, 1, 1], [], []>} : vector<16x256xf32>, vector<256x64xf32>, vector<16x64xf32> -> vector<16x64xf32>
    %c0_7 = arith.constant 0 : index
    %c0_8 = arith.constant 0 : index
    %8 = vector.load %arg1[%c0_7, %c0_8] : memref<16x64xf32, #tpu.memory_space<vmem>>, vector<16x64xf32>
    %c0_9 = arith.constant 0 : index
    %c0_10 = arith.constant 0 : index
    %9 = vector.load %arg3[%c0_9, %c0_10] : memref<64x64xf32, #tpu.memory_space<vmem>>, vector<64x64xf32>
    %cst_11 = arith.constant dense<0.000000e+00> : vector<16x64xf32>
    %10 = tpu.matmul %8, %9, %cst_11 {dimension_numbers = #tpu.dot_dimension_numbers<[1], [0], [0], [1], [0, 0, 1, 1], [], []>} : vector<16x64xf32>, vector<64x64xf32>, vector<16x64xf32> -> vector<16x64xf32>
    %11 = arith.negf %10 : vector<16x64xf32>
    %12 = math.exp %11 : vector<16x64xf32>
    %cst_12 = arith.constant 1.000000e+00 : f32
    %13 = vector.broadcast %cst_12 : f32 to vector<16x64xf32>
    %14 = arith.addf %13, %12 : vector<16x64xf32>
    %15 = arith.divf %13, %14 : vector<16x64xf32>
    %16 = arith.mulf %15, %7 : vector<16x64xf32>
    %c0_13 = arith.constant 0 : index
    %c0_14 = arith.constant 0 : index
    %17 = vector.load %arg6[%c0_13, %c0_14] : memref<16x64xf32, #tpu.memory_space<vmem>>, vector<16x64xf32>
    tpu.vector_store %arg6[%c0_13, %c0_14], %16 {strides = array<i32>} : memref<16x64xf32, #tpu.memory_space<vmem>>, vector<16x64xf32>,
    return
  }
  func.func @transform_0(%arg0: i32) -> (i32, i32) {
    %c0_i32 = arith.constant 0 : i32
    %c0_i32_0 = arith.constant 0 : i32
    return %arg0, %c0_i32 : i32, i32
  }
  func.func @transform_1(%arg0: i32) -> (i32, i32) {
    %c0_i32 = arith.constant 0 : i32
    %c0_i32_0 = arith.constant 0 : i32
    return %arg0, %c0_i32 : i32, i32
  }
  func.func @transform_2(%arg0: i32) -> (i32, i32) {
    %c0_i32 = arith.constant 0 : i32
    %c0_i32_0 = arith.constant 0 : i32
    %c0_i32_1 = arith.constant 0 : i32
    return %c0_i32, %c0_i32_0 : i32, i32
  }
  func.func @transform_3(%arg0: i32) -> (i32, i32) {
    %c0_i32 = arith.constant 0 : i32
    %c0_i32_0 = arith.constant 0 : i32
    %c0_i32_1 = arith.constant 0 : i32
    return %c0_i32, %c0_i32_0 : i32, i32
  }
  func.func @transform_4(%arg0: i32) -> (i32, i32) {
    %c0_i32 = arith.constant 0 : i32
    %c0_i32_0 = arith.constant 0 : i32
    %c0_i32_1 = arith.constant 0 : i32
    return %c0_i32, %c0_i32_0 : i32, i32
  }
  func.func @transform_5(%arg0: i32) -> (i32, i32) {
    %c0_i32 = arith.constant 0 : i32
    %c0_i32_0 = arith.constant 0 : i32
    return %arg0, %c0_i32 : i32, i32
  }
}

</mosaic_0001>

<bundles_post_ra>
// kernel: channel_mixing.1
= control target key start
LH: loop header
LB: loop body
LE: loop exit
PB: predicated region body
PF: predicated region fallthrough
CT: control target
= control target key end

     0   :  { %vm39_vm0 = vcmask 523264   ;;  %s554_s0 = inlined_call_operand.vmem [shape: f32[16,64], index: 0, kind: input, shape index: {}]   ;;  %s555_s1 = inlined_call_operand.vmem [shape: f32[16,64], index: 1, kind: input, shape index: {}]   ;;  %s556_s2 = inlined_call_operand.vmem [shape: f32[64,64], index: 2, kind: input, shape index: {}]   ;;  %s557_s3 = inlined_call_operand.vmem [shape: f32[64,256], index: 3, kind: input, shape index: {}]   ;;  %s558_s4 = inlined_call_operand.vmem [shape: f32[256,64], index: 4, kind: input, shape index: {}]   ;;  %s559_s5 = inlined_call_operand.hbm [shape: f32[16,64], index: 5, kind: output, shape index: {}]  }
   0x1   :  { %v37_v0 = vld [vmem:[%s557_s3 + $0x70] sm:$0xff]  ;;  %v38_v1 = vld [vmem:[%s557_s3 + $0x78] sm:$0xff]  ;;  %v35_v2 = vld [vmem:[%s557_s3 + $0x60] sm:$0xff] }
   0x2   :  { %54 = vmatpush.msra.mxu0 %v37_v0  ;;  %77 = vmatpush.msra.mxu1 %v38_v1  ;;  %v36_v3 = vld [vmem:[%s557_s3 + $0x68] sm:$0xff]  ;;  %v33_v4 = vld [vmem:[%s557_s3 + $0x50] sm:$0xff]  ;;  %v34_v5 = vld [vmem:[%s557_s3 + $0x58] sm:$0xff] }
   0x3   :  { %v31_v6 = vld [vmem:[%s557_s3 + $0x40] sm:$0xff]  ;;  %v32_v7 = vld [vmem:[%s557_s3 + $0x48] sm:$0xff]  ;;  %v29_v8 = vld [vmem:[%s557_s3 + $0x30] sm:$0xff] }
   0x4   :  { %55 = vmatpush.msra.mxu0 %v35_v2  ;;  %78 = vmatpush.msra.mxu1 %v36_v3  ;;  %v30_v9 = vld [vmem:[%s557_s3 + $0x38] sm:$0xff]  ;;  %v27_v10 = vld [vmem:[%s557_s3 + $0x20] sm:$0xff]  ;;  %v28_v12 = vld [vmem:[%s557_s3 + $0x28] sm:$0xff] }
   0x5   :  { %v115_v11 = vld [vmem:[%s558_s4 + $0x78] sm:$0xff]  ;;  %v114_v14 = vld [vmem:[%s558_s4 + $0x70] sm:$0xff]  ;;  %v113_v16 = vld [vmem:[%s558_s4 + $0x68] sm:$0xff] }
   0x6   :  { %56 = vmatpush.msra.mxu0 %v33_v4  ;;  %79 = vmatpush.msra.mxu1 %v34_v5  ;;  %v131_v13 = vld [vmem:[%s558_s4 + $0xf8] sm:$0xff]  ;;  %v130_v15 = vld [vmem:[%s558_s4 + $0xf0] sm:$0xff]  ;;  %v129_v19 = vld [vmem:[%s558_s4 + $0xe8] sm:$0xff] }
   0x7   :  { %132 = vmatpush.msra.mxu2 %v115_v11  ;;  %v25_v17 = vld [vmem:[%s557_s3 + $0x10] sm:$0xff]  ;;  %v26_v18 = vld [vmem:[%s557_s3 + $0x18] sm:$0xff]  ;;  %155 = vmatpush.msra.mxu3 %v131_v13  ;;  %v112_v20 = vld [vmem:[%s558_s4 + $0x60] sm:$0xff] }
   0x8   :  { %57 = vmatpush.msra.mxu0 %v31_v6  ;;  %80 = vmatpush.msra.mxu1 %v32_v7  ;;  %v23_v21 = vld [vmem:[%s557_s3] sm:$0xff]  ;;  %v24_v22 = vld [vmem:[%s557_s3 + $0x8] sm:$0xff]  ;;  %v187_v24 = vld [vmem:[%s556_s2 + $0x38] sm:$0xff] }
   0x9   :  { %133 = vmatpush.msra.mxu2 %v114_v14  ;;  %156 = vmatpush.msra.mxu3 %v130_v15  ;;  %v21_v23 = vld [vmem:[%s555_s1] sm:$0xff]  ;;  %v111_v26 = vld [vmem:[%s558_s4 + $0x58] sm:$0xff]  ;;  %v186_v27 = vld [vmem:[%s556_s2 + $0x30] sm:$0xff] }
   0xa   :  { %58 = vmatpush.msra.mxu0 %v29_v8  ;;  %81 = vmatpush.msra.mxu1 %v30_v9  ;;  %v128_v25 = vld [vmem:[%s558_s4 + $0xe0] sm:$0xff]  ;;  %v127_v28 = vld [vmem:[%s558_s4 + $0xd8] sm:$0xff]  ;;  %v110_v29 = vld [vmem:[%s558_s4 + $0x50] sm:$0xff] }
   0xb   :  { %134 = vmatpush.msra.mxu2 %v113_v16  ;;  %157 = vmatpush.msra.mxu3 %v129_v19  ;;  %v185_v30 = vld [vmem:[%s556_s2 + $0x28] sm:$0xff] }
   0xc   :  { %59 = vmatpush.msra.mxu0 %v27_v10  ;;  %82 = vmatpush.msra.mxu1 %v28_v12 }
   0xd   :  { %135 = vmatpush.msra.mxu2 %v112_v20  ;;  %158 = vmatpush.msra.mxu3 %v128_v25 }
   0xe   :  { %60 = vmatpush.msra.mxu0 %v25_v17  ;;  %83 = vmatpush.msra.mxu1 %v26_v18 }
   0xf   :  { %136 = vmatpush.msra.mxu2 %v111_v26 }
  0x10   :  { %61 = vmatpush.msra.mxu0 %v23_v21  ;;  %84 = vmatpush.msra.mxu1 %v24_v22 }
  0x11   :  { %277 = vmatmul.msk.f32.vlgmr.msra.gmra.mxu0 %vm39_vm0, %v21_v23  ;;  %279 = vmatmul.msk.f32.vlgmr.msra.gmra.mxu1 %vm39_vm0, %v21_v23 }
  0x12   :  { %202 = vmatpush.msrb.mxu0 %v187_v24  ;;  %285 = vmatpush.msrb.mxu1 %v187_v24 }
  0x13   :  { %10 = vsyncpa [#allocation3], 0  ;;  %v126_v31 = vld [vmem:[%s558_s4 + $0xd0] sm:$0xff]  ;;  %v109_v32 = vld [vmem:[%s558_s4 + $0x48] sm:$0xff]  ;;  %159 = vmatpush.msra.mxu3 %v127_v28  ;;  %137 = vmatpush.msra.mxu2 %v110_v29  ;;  %s265_s9 = sshll.u32 %s559_s5, 4  ;;  %s331_s10 = smov 128   ;;  %s266_s9 = int_to_ptr.hbm [resolvable:$true] %s265_s9 }
  0x14   :  { %203 = vmatpush.msrb.mxu0 %v186_v27  ;;  %286 = vmatpush.msrb.mxu1 %v186_v27  ;;  %v184_v33 = vld [vmem:[%s556_s2 + $0x20] sm:$0xff]  ;;  %v22_v34 = vld [vmem:[%s555_s1 + $0x8] sm:$0xff]  ;;  %v183_v35 = vld [vmem:[%s556_s2 + $0x18] sm:$0xff]  ;;  %s332_s11 = smov 8  }
  0x15   :  { %160 = vmatpush.msra.mxu3 %v126_v31  ;;  %138 = vmatpush.msra.mxu2 %v109_v32  ;;  %v125_v36 = vld [vmem:[%s558_s4 + $0xc8] sm:$0xff]  ;;  %v108_v37 = vld [vmem:[%s558_s4 + $0x40] sm:$0xff]  ;;  %v182_v38 = vld [vmem:[%s556_s2 + $0x10] sm:$0xff] }
  0x16   :  { %204 = vmatpush.msrb.mxu0 %v185_v30  ;;  %287 = vmatpush.msrb.mxu1 %v185_v30  ;;  %v124_v39 = vld [vmem:[%s558_s4 + $0xc0] sm:$0xff]  ;;  %v107_v40 = vld [vmem:[%s558_s4 + $0x38] sm:$0xff]  ;;  %v181_v41 = vld [vmem:[%s556_s2 + $0x8] sm:$0xff] }
  0x17   :  { %161 = vmatpush.msra.mxu3 %v125_v36  ;;  %139 = vmatpush.msra.mxu2 %v108_v37  ;;  %v123_v42 = vld [vmem:[%s558_s4 + $0xb8] sm:$0xff]  ;;  %v106_v43 = vld [vmem:[%s558_s4 + $0x30] sm:$0xff]  ;;  %v180_v44 = vld [vmem:[%s556_s2] sm:$0xff] }
  0x18   :  { %205 = vmatpush.msrb.mxu0 %v184_v33  ;;  %288 = vmatpush.msrb.mxu1 %v184_v33  ;;  %v178_v45 = vld [vmem:[%s554_s0] sm:$0xff]  ;;  %v179_v46 = vld [vmem:[%s554_s0 + $0x8] sm:$0xff]  ;;  %v122_v47 = vld [vmem:[%s558_s4 + $0xb0] sm:$0xff] }
  0x19   :  { %278 = vmatmul.msk.f32.gmra.mxu0 %vm39_vm0, %v22_v34  ;;  %280 = vmatmul.msk.f32.gmra.mxu1 %vm39_vm0, %v22_v34  ;;  %v105_v48 = vld [vmem:[%s558_s4 + $0x28] sm:$0xff]  ;;  %v104_v50 = vld [vmem:[%s558_s4 + $0x20] sm:$0xff]  ;;  %v103_v52 = vld [vmem:[%s558_s4 + $0x18] sm:$0xff] }
  0x1a   :  { %206 = vmatpush.msrb.mxu0 %v183_v35  ;;  %289 = vmatpush.msrb.mxu1 %v183_v35  ;;  %v121_v49 = vld [vmem:[%s558_s4 + $0xa8] sm:$0xff]  ;;  %v120_v51 = vld [vmem:[%s558_s4 + $0xa0] sm:$0xff]  ;;  %v119_v53 = vld [vmem:[%s558_s4 + $0x98] sm:$0xff] }
  0x1b   :  { %162 = vmatpush.msra.mxu3 %v124_v39  ;;  %140 = vmatpush.msra.mxu2 %v107_v40  ;;  %v102_v54 = vld [vmem:[%s558_s4 + $0x10] sm:$0xff]  ;;  %v101_v56 = vld [vmem:[%s558_s4 + $0x8] sm:$0xff]  ;;  %v100_v58 = vld [vmem:[%s558_s4] sm:$0xff] }
  0x1c   :  { %207 = vmatpush.msrb.mxu0 %v182_v38  ;;  %290 = vmatpush.msrb.mxu1 %v182_v38  ;;  %v118_v55 = vld [vmem:[%s558_s4 + $0x90] sm:$0xff]  ;;  %v117_v57 = vld [vmem:[%s558_s4 + $0x88] sm:$0xff]  ;;  %v116_v59 = vld [vmem:[%s558_s4 + $0x80] sm:$0xff]  ;;  %s330_s4 = smov [#allocation2]  }
  0x1d   :  { %163 = vmatpush.msra.mxu3 %v123_v42  ;;  %141 = vmatpush.msra.mxu2 %v106_v43  ;;  %s263_s6 = sshll.u32 %s330_s4, 4  ;;  %s264_s6 = int_to_ptr.vmem [resolvable:$true] %s263_s6 }
  0x1e   :  { %208 = vmatpush.msrb.mxu0 %v181_v41  ;;  %291 = vmatpush.msrb.mxu1 %v181_v41 }
  0x1f   :  { %164 = vmatpush.msra.mxu3 %v122_v47  ;;  %142 = vmatpush.msra.mxu2 %v105_v48 }
  0x20   :  { %209 = vmatpush.msrb.mxu0 %v180_v44  ;;  %292 = vmatpush.msrb.mxu1 %v180_v44 }
  0x21   :  { %281 = vmatmul.msk.f32.vlgmr.msrb.gmra.mxu0 %vm39_vm0, %v178_v45  ;;  %282 = vmatmul.msk.f32.vlgmr.msrb.gmra.mxu1 %vm39_vm0, %v179_v46 }
  0x22   :  { %165 = vmatpush.msra.mxu3 %v121_v49  ;;  %143 = vmatpush.msra.mxu2 %v104_v50 }
  0x24   :  { %166 = vmatpush.msra.mxu3 %v120_v51  ;;  %144 = vmatpush.msra.mxu2 %v103_v52 }
  0x26   :  { %167 = vmatpush.msra.mxu3 %v119_v53  ;;  %145 = vmatpush.msra.mxu2 %v102_v54 }
  0x28   :  { %168 = vmatpush.msra.mxu3 %v118_v55  ;;  %146 = vmatpush.msra.mxu2 %v101_v56 }
  0x2a   :  { %169 = vmatpush.msra.mxu3 %v117_v57  ;;  %147 = vmatpush.msra.mxu2 %v100_v58 }
  0x2c   :  { %170 = vmatpush.msra.mxu3 %v116_v59 }
  0x8e   :  { %v63_v60 = vpop.f32.mrf.mxu0  ;;  %v86_v61 = vpop.f32.mrf.mxu1 }
  0x8f   :  { %v92_v62 = vmax.f32 %v63_v60, 0.0  ;;  %v93_v63 = vmax.f32 %v86_v61, 0.0 }
  0x91   :  { %v96_v0 = vmul.f32 %v92_v62, %v92_v62  ;;  %v97_v1 = vmul.f32 %v93_v63, %v93_v63 }
  0x93   :  { %148 = vmatmul.f32.vlgmr.msra.gmra.mxu2 %v96_v0  ;;  %171 = vmatmul.f32.vlgmr.msra.gmra.mxu3 %v97_v1 }
  0x96   :  { %v66_v2 = vpop.f32.mrf.mxu0  ;;  %v89_v3 = vpop.f32.mrf.mxu1 }
  0x97   :  { %v94_v4 = vmax.f32 %v66_v2, 0.0  ;;  %v95_v5 = vmax.f32 %v89_v3, 0.0 }
  0x99   :  { %v98_v6 = vmul.f32 %v94_v4, %v94_v4  ;;  %v99_v7 = vmul.f32 %v95_v5, %v95_v5 }
  0x9b   :  { %151 = vmatmul.f32.gmra.mxu2 %v98_v6  ;;  %174 = vmatmul.f32.gmra.mxu3 %v99_v7 }
  0x9e   :  { %v211_v8 = vpop.f32.mrf.mxu0  ;;  %v214_v10 = vpop.f32.mrf.mxu1 }
  0x9f   :  { %v283_v9 = vmul.f32 -1.442695, %v211_v8  ;;  %v284_v11 = vmul.f32 -1.442695, %v214_v10 }
  0xa1   :  { %296 = vpow2.f32 %v283_v9 }
  0xa2   :  { %298 = vpow2.f32 %v284_v11 }
  0xa7   :  { %v297_v12 = vpop.eup %296 }
  0xa8   :  { %v223_v13 = vadd.f32 1.0, %v297_v12  ;;  %v299_v14 = vpop.eup %298 }
  0xa9   :  { %v224_v15 = vadd.f32 1.0, %v299_v14 }
  0xaa   :  { %300 = vrcp.f32 %v223_v13  ;;  %vm230_vm1 = vweird.f32 %v223_v13  ;;  %v236_v22 = vand.u32 2147483648, %v223_v13  ;;  %v234_v24 = vand.u32 2147483647, %v223_v13 }
  0xab   :  { %302 = vrcp.f32 %v224_v15  ;;  %vm245_vm5 = vweird.f32 %v224_v15  ;;  %v251_v33 = vand.u32 2147483648, %v224_v15  ;;  %v249_v36 = vand.u32 2147483647, %v224_v15 }
  0xac   :  { %v237_v26 = vor.u32 1.1754944e-38, %v236_v22  ;;  %vm235_vm4 = vcmp.eq.f32.partialorder %v234_v24, 8.507059e+37 }
  0xad   :  { %v252_v37 = vor.u32 1.1754944e-38, %v251_v33  ;;  %vm250_vm8 = vcmp.eq.f32.partialorder %v249_v36, 8.507059e+37 }
  0xb0   :  { %v301_v16 = vpop.eup %300 }
  0xb1   :  { %v226_v17 = vmul.f32 %v301_v16, %v223_v13  ;;  %v303_v19 = vpop.eup %302  ;;  %vm231_vm2 = vweird.f32 %v301_v16 }
  0xb2   :  { %v241_v20 = vmul.f32 %v303_v19, %v224_v15  ;;  %vm232_vm3 = vmor %vm230_vm1, %vm231_vm2  ;;  %vm246_vm6 = vweird.f32 %v303_v19 }
  0xb3   :  { %v227_v18 = vsub.f32 1.0, %v226_v17  ;;  %vm247_vm7 = vmor %vm245_vm5, %vm246_vm6 }
  0xb4   :  { %v242_v25 = vsub.f32 1.0, %v241_v20 }
  0xb5   :  { %v228_v21 = vmul.f32 %v301_v16, %v227_v18 }
  0xb6   :  { %v243_v28 = vmul.f32 %v303_v19, %v242_v25 }
  0xb7   :  { %v229_v23 = vadd.f32 %v301_v16, %v228_v21 }
  0xb8   :  { %v244_v35 = vadd.f32 %v303_v19, %v243_v28 }
  0xb9   :  { %v233_v27 = vsel %vm232_vm3, %v301_v16, %v229_v23 }
  0xba   :  { %v238_v32 = vsel %vm235_vm4, %v237_v26, %v233_v27  ;;  %v248_v38 = vsel %vm247_vm7, %v303_v19, %v244_v35 }
  0xbb   :  { %v253_v42 = vsel %vm250_vm8, %v252_v37, %v248_v38 }
 0x116   :  { %v149_v29 = vpop.f32.mrf.mxu2  ;;  %v172_v30 = vpop.f32.mrf.mxu3 }
 0x117   :  { %v173_v31 = vadd.f32 %v172_v30, %v149_v29 }
 0x119   :  { %v255_v34 = vmul.f32 %v238_v32, %v173_v31 }
 0x11b   :  { %257 = vst.msk [vmem:[#allocation2] sm:$0xff] %vm39_vm0, %v255_v34 }
 0x11e   :  { %v152_v39 = vpop.f32.mrf.mxu2  ;;  %v175_v40 = vpop.f32.mrf.mxu3 }
 0x11f   :  { %v176_v41 = vadd.f32 %v175_v40, %v152_v39 }
 0x121   :  { %v256_v43 = vmul.f32 %v253_v42, %v176_v41 }
 0x123   :  { %258 = vst.msk [vmem:[#allocation2 + $0x8] sm:$0xff] %vm39_vm0, %v256_v43 }
 0x124   :  { %271 = dma.vmem_to_hbm [thread:$0]  %s264_s6, 256, %s266_s9, [#allocation3], %s331_s10, %s331_s10, %s332_s11  }
 0x125   :  { %328 = dma.done.wait [#allocation3], 256  }
 0x126   :  { %329 = vsyncadd [#allocation3], 4294967040 }
 0x127   :  { %276 = vsyncpa [#allocation3], 1 }

</bundles_post_ra>
